<compile_context>
chip_gen: v7x
topology: tpu7x:2x2x1
jax: 0.10.0
libtpu: 0.0.40
codegen_flags: <defaults>
</compile_context>

<pallas_src>
import functools
import math

import jax
import jax.numpy as jnp
from jax.experimental import pallas as pl
from jax.experimental.pallas import tpu as pltpu


def _upsample_kernel(xm_ref, xh_ref, w_ref, b_ref, o_ref, xs_ref,
                     *, TH, W, C, Cout):
    """One (batch, row-tile) grid step.

    xm_ref : (TH,  W+2, C)        bf16  padded input rows [h*TH, h*TH+TH)
    xh_ref : (2,   W+2, C)        bf16  2-row bottom halo [h*TH+TH, h*TH+TH+2)
    w_ref  : (2, 2, 3*C, 2*Cout)  bf16  fused weights [dy, th, s*C+ci, dx*Cout+co]
    b_ref  : (1, 2*Cout)          f32   bias replicated over dx
    o_ref  : (TH, 2, W, 2*Cout)   f32   o[m, dy, n, dx*Cout+co]
    xs_ref : ((TH+2)*W, 3*C)      bf16  scratch: 3 column-shifted slabs, K-concat
    """
    M = TH * W
    # Stage the 3 distinct column-shifted windows once (the 16 phase/tap slabs of
    # the naive formulation dedupe to these; row shifts below are plain 8-aligned
    # row offsets into the scratch — no further relayout copies).
    for s in range(3):
        xs_ref[0:M, s * C:(s + 1) * C] = xm_ref[:, s:s + W, :].reshape(M, C)
        xs_ref[M:M + 2 * W, s * C:(s + 1) * C] = (
            xh_ref[:, s:s + W, :].reshape(2 * W, C))

    bias = b_ref[...]                                       # (1, 2*Cout)
    for dy in range(2):
        # Two wide MXU dots per row-parity; tap accumulation happens inside the MXU.
        acc = jnp.dot(xs_ref[dy * W:dy * W + M, :], w_ref[dy, 0],
                      preferred_element_type=jnp.float32)
        acc = acc + jnp.dot(xs_ref[(dy + 1) * W:(dy + 1) * W + M, :],
                            w_ref[dy, 1],
                            preferred_element_type=jnp.float32)
        acc = acc + bias
        # (M, 2*Cout) -> (TH, W, 2*Cout): minor dim unchanged (cheap reshape).
        o_ref[:, dy, :, :] = acc.reshape(TH, W, 2 * Cout).astype(o_ref.dtype)


def _fuse_params(weight, bias, compute_dtype=jnp.bfloat16):
    """Build the per-(dy, th) K/N-fused weight table and dx-replicated bias.

    weight : (C, Cout, 4, 4)  PyTorch ConvTranspose2d layout (in, out, kh, kw)
    returns w_cat (2, 2, 3*C, 2*Cout) bf16, b_cat (1, 2*Cout) f32.
    (In real use this is precomputed once at parameter-load time.)
    """
    C, Cout = weight.shape[0], weight.shape[1]
    w = jnp.zeros((2, 2, 3, C, 2, Cout), jnp.float32)       # [dy, th, s, ci, dx, co]
    for dy in range(2):
        for th in range(2):
            for s in range(3):
                for dx in range(2):
                    tw = s - dx
                    if tw in (0, 1):
                        w = w.at[dy, th, s, :, dx, :].set(
                            weight[:, :, 3 - dy - 2 * th, 3 - dx - 2 * tw])
    w_cat = w.reshape(2, 2, 3 * C, 2 * Cout).astype(compute_dtype)
    b_cat = jnp.concatenate([bias, bias]).reshape(1, 2 * Cout).astype(jnp.float32)
    return w_cat, b_cat


def upsample(x, weight, bias, t=None, *, tile_h=8):
    """ConvTranspose2d(C, C, (4,4), stride 2, pad 1) forward (== Upsample.forward)."""
    del t  # the PyTorch forward ignores t
    B, C, H, W = x.shape
    Cin, Cout, KH, KW = weight.shape
    assert (KH, KW) == (4, 4) and Cin == C, (weight.shape, x.shape)
    assert H % 2 == 0, "odd H not supported by the row tiling"
    # TODO(synk): odd H -> fall back to a single whole-image tile.

    # Pick an even row-tile that divides H (2 halo rows are re-read per tile).
    TH = H
    for cand in (tile_h, 8, 4, 2):
        if cand <= H and H % cand == 0 and cand % 2 == 0:
            TH = cand
            break

    # ---- wrapper-side layout plumbing (one pass each) -----------------------
    # TODO(synk): keep the model NHWC to drop this transpose, and zero-fill the
    #             halo in-kernel instead of materializing a padded copy.
    x_nhwc = jnp.transpose(x, (0, 2, 3, 1)).astype(jnp.bfloat16)
    x_pad = jnp.pad(x_nhwc, ((0, 0), (1, 1), (1, 1), (0, 0)))
    w_cat, b_cat = _fuse_params(weight, bias)

    kernel = functools.partial(_upsample_kernel, TH=TH, W=W, C=C, Cout=Cout)
    grid = (B, H // TH)

    out5 = pl.pallas_call(
        kernel,
        out_shape=jax.ShapeDtypeStruct((B, H, 2, W, 2 * Cout), jnp.float32),
        grid=grid,
        in_specs=[
            # main TH padded rows of this tile
            pl.BlockSpec((None, TH, W + 2, C), lambda b, h: (b, h, 0, 0)),
            # 2-row bottom halo (same x_pad array, overlapping read)
            pl.BlockSpec((None, 2, W + 2, C),
                         lambda b, h: (b, (h + 1) * (TH // 2), 0, 0)),
            # grid-invariant fused weights / bias (constant index map -> fetched once)
            pl.BlockSpec((2, 2, 3 * C, 2 * Cout), lambda b, h: (0, 0, 0, 0)),
            pl.BlockSpec((1, 2 * Cout), lambda b, h: (0, 0)),
        ],
        out_specs=pl.BlockSpec((None, TH, 2, W, 2 * Cout),
                               lambda b, h: (b, h, 0, 0, 0)),
        scratch_shapes=[pltpu.VMEM(((TH + 2) * W, 3 * C), jnp.bfloat16)],
        compiler_params=pltpu.CompilerParams(
            dimension_semantics=("parallel", "parallel"),
            vmem_limit_bytes=32 * 1024 * 1024),
    )(x_pad, x_pad, w_cat, b_cat)

    # (B, H, 2, W, 2*Cout) -> (B, 2H, 2W, Cout): free, row-major-identical reshape
    # (the dy / dx phase interleave costs nothing here).
    out = out5.reshape(B, 2 * H, 2 * W, Cout)
    return jnp.transpose(out, (0, 3, 1, 2))                  # NCHW to match the module


def _reference(x, weight, bias):
    """PyTorch-equivalent ConvTranspose2d via a dilated correlation."""
    k = jnp.transpose(weight[:, :, ::-1, ::-1], (1, 0, 2, 3))   # (Cout, Cin, 4, 4)
    y = jax.lax.conv_general_dilated(
        x, k,
        window_strides=(1, 1),
        padding=((2, 2), (2, 2)),
        lhs_dilation=(2, 2),
        rhs_dilation=(1, 1),
        dimension_numbers=("NCHW", "OIHW", "NCHW"),
        precision=jax.lax.Precision.HIGHEST)
    return y + bias.reshape(1, -1, 1, 1)


def _run_case(key, B, C, H, W):
    k_x, k_w, k_b = jax.random.split(key, 3)
    x = jax.random.normal(k_x, (B, C, H, W), jnp.float32)
    w = jax.random.normal(k_w, (C, C, 4, 4), jnp.float32) / math.sqrt(C * 16)
    b = jax.random.normal(k_b, (C,), jnp.float32) * 0.1
    t = jnp.zeros((B,), jnp.float32)  # unused, as in the PyTorch forward

    out = jax.block_until_ready(upsample(x, w, b, t))
    ref = _reference(x, w, b)
    assert out.shape == (B, C, 2 * H, 2 * W), out.shape
    err = float(jnp.max(jnp.abs(out - ref)))
    assert jnp.allclose(out, ref, atol=3e-2, rtol=3e-2), f"max abs err {err}"


if __name__ == "__main__":
    key = jax.random.PRNGKey(0)
    k1, k2 = jax.random.split(key)
    # tiny config implied by the module (channels=4, spatial=16); exercises the
    # 2-tile halo path with padded lanes
    _run_case(k1, B=2, C=4, H=16, W=16)
    # lane-dense UNet-ish config: Cout=128 lanes, 2*Cout = 256-wide MXU N
    _run_case(k2, B=2, C=128, H=16, W=16)
    print("KERNEL_OK")
</pallas_src>

<mosaic_0001>
module attributes {stable_mosaic.version = 11 : i64} {
  func.func @_upsample_kernel(%arg0: i32, %arg1: i32, %arg2: memref<1x8x18x4xbf16, #tpu.memory_space<vmem>>, %arg3: memref<1x2x18x4xbf16, #tpu.memory_space<vmem>>, %arg4: memref<2x2x12x8xbf16, #tpu.memory_space<vmem>>, %arg5: memref<1x8xf32, #tpu.memory_space<vmem>>, %arg6: memref<1x8x2x16x8xf32, #tpu.memory_space<vmem>>, %arg7: memref<160x12xbf16, #tpu.memory_space<vmem>>) attributes {dimension_semantics = [#tpu.dimension_semantics<parallel>, #tpu.dimension_semantics<parallel>], iteration_bounds = array<i64: 2, 2>, scalar_prefetch = 0 : i64, scratch_operands = 1 : i64, tpu.core_type = #tpu.core_type<tc>, window_params = [{transform_indices = @transform_0, window_bounds = array<i64: 1, 8, 18, 4>}, {transform_indices = @transform_1, window_bounds = array<i64: 1, 2, 18, 4>}, {pipeline_mode = #tpu.pipeline_mode<synchronous>, transform_indices = @transform_2, window_bounds = array<i64: 2, 2, 12, 8>}, {pipeline_mode = #tpu.pipeline_mode<synchronous>, transform_indices = @transform_3, window_bounds = array<i64: 1, 8>}, {transform_indices = @transform_4, window_bounds = array<i64: 1, 8, 2, 16, 8>}]} {
    %c0 = arith.constant 0 : index
    %c0_0 = arith.constant 0 : index
    %c0_1 = arith.constant 0 : index
    %c0_2 = arith.constant 0 : index
    %0 = vector.load %arg2[%c0, %c0_0, %c0_1, %c0_2] : memref<1x8x18x4xbf16, #tpu.memory_space<vmem>>, vector<1x8x16x4xbf16>
    %1 = vector.shape_cast %0 : vector<1x8x16x4xbf16> to vector<8x16x4xbf16>
    %2 = vector.shape_cast %1 : vector<8x16x4xbf16> to vector<128x4xbf16>
    %c0_3 = arith.constant 0 : index
    %c0_4 = arith.constant 0 : index
    %3 = vector.load %arg7[%c0_3, %c0_4] : memref<160x12xbf16, #tpu.memory_space<vmem>>, vector<128x4xbf16>
    tpu.vector_store %arg7[%c0_3, %c0_4], %2 {strides = array<i32>} : memref<160x12xbf16, #tpu.memory_space<vmem>>, vector<128x4xbf16>,
    %c0_5 = arith.constant 0 : index
    %c0_6 = arith.constant 0 : index
    %c0_7 = arith.constant 0 : index
    %c0_8 = arith.constant 0 : index
    %4 = vector.load %arg3[%c0_5, %c0_6, %c0_7, %c0_8] : memref<1x2x18x4xbf16, #tpu.memory_space<vmem>>, vector<1x2x16x4xbf16>
    %5 = vector.shape_cast %4 : vector<1x2x16x4xbf16> to vector<2x16x4xbf16>
    %6 = vector.shape_cast %5 : vector<2x16x4xbf16> to vector<32x4xbf16>
    %c128 = arith.constant 128 : index
    %c0_9 = arith.constant 0 : index
    %7 = vector.load %arg7[%c128, %c0_9] : memref<160x12xbf16, #tpu.memory_space<vmem>>, vector<32x4xbf16>
    tpu.vector_store %arg7[%c128, %c0_9], %6 {strides = array<i32>} : memref<160x12xbf16, #tpu.memory_space<vmem>>, vector<32x4xbf16>,
    %c0_10 = arith.constant 0 : index
    %c0_11 = arith.constant 0 : index
    %c1 = arith.constant 1 : index
    %c0_12 = arith.constant 0 : index
    %8 = vector.load %arg2[%c0_10, %c0_11, %c1, %c0_12] : memref<1x8x18x4xbf16, #tpu.memory_space<vmem>>, vector<1x8x16x4xbf16>
    %9 = vector.shape_cast %8 : vector<1x8x16x4xbf16> to vector<8x16x4xbf16>
    %10 = vector.shape_cast %9 : vector<8x16x4xbf16> to vector<128x4xbf16>
    %c0_13 = arith.constant 0 : index
    %c4 = arith.constant 4 : index
    %11 = vector.load %arg7[%c0_13, %c4] : memref<160x12xbf16, #tpu.memory_space<vmem>>, vector<128x4xbf16>
    tpu.vector_store %arg7[%c0_13, %c4], %10 {strides = array<i32>} : memref<160x12xbf16, #tpu.memory_space<vmem>>, vector<128x4xbf16>,
    %c0_14 = arith.constant 0 : index
    %c0_15 = arith.constant 0 : index
    %c1_16 = arith.constant 1 : index
    %c0_17 = arith.constant 0 : index
    %12 = vector.load %arg3[%c0_14, %c0_15, %c1_16, %c0_17] : memref<1x2x18x4xbf16, #tpu.memory_space<vmem>>, vector<1x2x16x4xbf16>
    %13 = vector.shape_cast %12 : vector<1x2x16x4xbf16> to vector<2x16x4xbf16>
    %14 = vector.shape_cast %13 : vector<2x16x4xbf16> to vector<32x4xbf16>
    %c128_18 = arith.constant 128 : index
    %c4_19 = arith.constant 4 : index
    %15 = vector.load %arg7[%c128_18, %c4_19] : memref<160x12xbf16, #tpu.memory_space<vmem>>, vector<32x4xbf16>
    tpu.vector_store %arg7[%c128_18, %c4_19], %14 {strides = array<i32>} : memref<160x12xbf16, #tpu.memory_space<vmem>>, vector<32x4xbf16>,
    %c0_20 = arith.constant 0 : index
    %c0_21 = arith.constant 0 : index
    %c2 = arith.constant 2 : index
    %c0_22 = arith.constant 0 : index
    %16 = vector.load %arg2[%c0_20, %c0_21, %c2, %c0_22] : memref<1x8x18x4xbf16, #tpu.memory_space<vmem>>, vector<1x8x16x4xbf16>
    %17 = vector.shape_cast %16 : vector<1x8x16x4xbf16> to vector<8x16x4xbf16>
    %18 = vector.shape_cast %17 : vector<8x16x4xbf16> to vector<128x4xbf16>
    %c0_23 = arith.constant 0 : index
    %c8 = arith.constant 8 : index
    %19 = vector.load %arg7[%c0_23, %c8] : memref<160x12xbf16, #tpu.memory_space<vmem>>, vector<128x4xbf16>
    tpu.vector_store %arg7[%c0_23, %c8], %18 {strides = array<i32>} : memref<160x12xbf16, #tpu.memory_space<vmem>>, vector<128x4xbf16>,
    %c0_24 = arith.constant 0 : index
    %c0_25 = arith.constant 0 : index
    %c2_26 = arith.constant 2 : index
    %c0_27 = arith.constant 0 : index
    %20 = vector.load %arg3[%c0_24, %c0_25, %c2_26, %c0_27] : memref<1x2x18x4xbf16, #tpu.memory_space<vmem>>, vector<1x2x16x4xbf16>
    %21 = vector.shape_cast %20 : vector<1x2x16x4xbf16> to vector<2x16x4xbf16>
    %22 = vector.shape_cast %21 : vector<2x16x4xbf16> to vector<32x4xbf16>
    %c128_28 = arith.constant 128 : index
    %c8_29 = arith.constant 8 : index
    %23 = vector.load %arg7[%c128_28, %c8_29] : memref<160x12xbf16, #tpu.memory_space<vmem>>, vector<32x4xbf16>
    tpu.vector_store %arg7[%c128_28, %c8_29], %22 {strides = array<i32>} : memref<160x12xbf16, #tpu.memory_space<vmem>>, vector<32x4xbf16>,
    %c0_30 = arith.constant 0 : index
    %c0_31 = arith.constant 0 : index
    %24 = vector.load %arg5[%c0_30, %c0_31] : memref<1x8xf32, #tpu.memory_space<vmem>>, vector<1x8xf32>
    %c0_32 = arith.constant 0 : index
    %c0_33 = arith.constant 0 : index
    %25 = vector.load %arg7[%c0_32, %c0_33] : memref<160x12xbf16, #tpu.memory_space<vmem>>, vector<128x12xbf16>
    %c0_34 = arith.constant 0 : index
    %c0_35 = arith.constant 0 : index
    %c0_36 = arith.constant 0 : index
    %c0_37 = arith.constant 0 : index
    %26 = vector.load %arg4[%c0_34, %c0_35, %c0_36, %c0_37] : memref<2x2x12x8xbf16, #tpu.memory_space<vmem>>, vector<1x1x12x8xbf16>
    %27 = vector.shape_cast %26 : vector<1x1x12x8xbf16> to vector<12x8xbf16>
    %cst = arith.constant dense<0.000000e+00> : vector<128x8xf32>
    %28 = tpu.matmul %25, %27, %cst {dimension_numbers = #tpu.dot_dimension_numbers<[1], [0], [0], [1], [0, 0, 1, 1], [], []>} : vector<128x12xbf16>, vector<12x8xbf16>, vector<128x8xf32> -> vector<128x8xf32>
    %c16 = arith.constant 16 : index
    %c0_38 = arith.constant 0 : index
    %29 = vector.load %arg7[%c16, %c0_38] : memref<160x12xbf16, #tpu.memory_space<vmem>>, vector<128x12xbf16>
    %c0_39 = arith.constant 0 : index
    %c1_40 = arith.constant 1 : index
    %c0_41 = arith.constant 0 : index
    %c0_42 = arith.constant 0 : index
    %30 = vector.load %arg4[%c0_39, %c1_40, %c0_41, %c0_42] : memref<2x2x12x8xbf16, #tpu.memory_space<vmem>>, vector<1x1x12x8xbf16>
    %31 = vector.shape_cast %30 : vector<1x1x12x8xbf16> to vector<12x8xbf16>
    %cst_43 = arith.constant dense<0.000000e+00> : vector<128x8xf32>
    %32 = tpu.matmul %29, %31, %cst_43 {dimension_numbers = #tpu.dot_dimension_numbers<[1], [0], [0], [1], [0, 0, 1, 1], [], []>} : vector<128x12xbf16>, vector<12x8xbf16>, vector<128x8xf32> -> vector<128x8xf32>
    %33 = arith.addf %28, %32 : vector<128x8xf32>
    %34 = vector.broadcast %24 : vector<1x8xf32> to vector<128x8xf32>
    %35 = arith.addf %33, %34 : vector<128x8xf32>
    %36 = vector.shape_cast %35 : vector<128x8xf32> to vector<8x16x8xf32>
    %c0_44 = arith.constant 0 : index
    %c0_45 = arith.constant 0 : index
    %c0_46 = arith.constant 0 : index
    %c0_47 = arith.constant 0 : index
    %c0_48 = arith.constant 0 : index
    %37 = vector.load %arg6[%c0_44, %c0_45, %c0_46, %c0_47, %c0_48] : memref<1x8x2x16x8xf32, #tpu.memory_space<vmem>>, vector<1x8x1x16x8xf32>
    %38 = vector.shape_cast %37 : vector<1x8x1x16x8xf32> to vector<8x16x8xf32>
    %39 = vector.shape_cast %36 : vector<8x16x8xf32> to vector<1x8x1x16x8xf32>
    tpu.vector_store %arg6[%c0_44, %c0_45, %c0_46, %c0_47, %c0_48], %39 {strides = array<i32>} : memref<1x8x2x16x8xf32, #tpu.memory_space<vmem>>, vector<1x8x1x16x8xf32>,
    %c16_49 = arith.constant 16 : index
    %c0_50 = arith.constant 0 : index
    %40 = vector.load %arg7[%c16_49, %c0_50] : memref<160x12xbf16, #tpu.memory_space<vmem>>, vector<128x12xbf16>
    %c1_51 = arith.constant 1 : index
    %c0_52 = arith.constant 0 : index
    %c0_53 = arith.constant 0 : index
    %c0_54 = arith.constant 0 : index
    %41 = vector.load %arg4[%c1_51, %c0_52, %c0_53, %c0_54] : memref<2x2x12x8xbf16, #tpu.memory_space<vmem>>, vector<1x1x12x8xbf16>
    %42 = vector.shape_cast %41 : vector<1x1x12x8xbf16> to vector<12x8xbf16>
    %cst_55 = arith.constant dense<0.000000e+00> : vector<128x8xf32>
    %43 = tpu.matmul %40, %42, %cst_55 {dimension_numbers = #tpu.dot_dimension_numbers<[1], [0], [0], [1], [0, 0, 1, 1], [], []>} : vector<128x12xbf16>, vector<12x8xbf16>, vector<128x8xf32> -> vector<128x8xf32>
    %c32 = arith.constant 32 : index
    %c0_56 = arith.constant 0 : index
    %44 = vector.load %arg7[%c32, %c0_56] : memref<160x12xbf16, #tpu.memory_space<vmem>>, vector<128x12xbf16>
    %c1_57 = arith.constant 1 : index
    %c1_58 = arith.constant 1 : index
    %c0_59 = arith.constant 0 : index
    %c0_60 = arith.constant 0 : index
    %45 = vector.load %arg4[%c1_57, %c1_58, %c0_59, %c0_60] : memref<2x2x12x8xbf16, #tpu.memory_space<vmem>>, vector<1x1x12x8xbf16>
    %46 = vector.shape_cast %45 : vector<1x1x12x8xbf16> to vector<12x8xbf16>
    %cst_61 = arith.constant dense<0.000000e+00> : vector<128x8xf32>
    %47 = tpu.matmul %44, %46, %cst_61 {dimension_numbers = #tpu.dot_dimension_numbers<[1], [0], [0], [1], [0, 0, 1, 1], [], []>} : vector<128x12xbf16>, vector<12x8xbf16>, vector<128x8xf32> -> vector<128x8xf32>
    %48 = arith.addf %43, %47 : vector<128x8xf32>
    %49 = vector.broadcast %24 : vector<1x8xf32> to vector<128x8xf32>
    %50 = arith.addf %48, %49 : vector<128x8xf32>
    %51 = vector.shape_cast %50 : vector<128x8xf32> to vector<8x16x8xf32>
    %c0_62 = arith.constant 0 : index
    %c0_63 = arith.constant 0 : index
    %c1_64 = arith.constant 1 : index
    %c0_65 = arith.constant 0 : index
    %c0_66 = arith.constant 0 : index
    %52 = vector.load %arg6[%c0_62, %c0_63, %c1_64, %c0_65, %c0_66] : memref<1x8x2x16x8xf32, #tpu.memory_space<vmem>>, vector<1x8x1x16x8xf32>
    %53 = vector.shape_cast %52 : vector<1x8x1x16x8xf32> to vector<8x16x8xf32>
    %54 = vector.shape_cast %51 : vector<8x16x8xf32> to vector<1x8x1x16x8xf32>
    tpu.vector_store %arg6[%c0_62, %c0_63, %c1_64, %c0_65, %c0_66], %54 {strides = array<i32>} : memref<1x8x2x16x8xf32, #tpu.memory_space<vmem>>, vector<1x8x1x16x8xf32>,
    return
  }
  func.func @transform_0(%arg0: i32, %arg1: i32) -> (i32, i32, i32, i32) {
    %c0_i32 = arith.constant 0 : i32
    %c0_i32_0 = arith.constant 0 : i32
    %c0_i32_1 = arith.constant 0 : i32
    return %arg0, %arg1, %c0_i32, %c0_i32_0 : i32, i32, i32, i32
  }
  func.func @transform_1(%arg0: i32, %arg1: i32) -> (i32, i32, i32, i32) {
    %c1_i32 = arith.constant 1 : i32
    %0 = arith.addi %arg1, %c1_i32 : i32
    %c4_i32 = arith.constant 4 : i32
    %1 = arith.muli %0, %c4_i32 : i32
    %c0_i32 = arith.constant 0 : i32
    %c0_i32_0 = arith.constant 0 : i32
    %c0_i32_1 = arith.constant 0 : i32
    return %arg0, %1, %c0_i32, %c0_i32_0 : i32, i32, i32, i32
  }
  func.func @transform_2(%arg0: i32, %arg1: i32) -> (i32, i32, i32, i32) {
    %c0_i32 = arith.constant 0 : i32
    %c0_i32_0 = arith.constant 0 : i32
    %c0_i32_1 = arith.constant 0 : i32
    %c0_i32_2 = arith.constant 0 : i32
    %c0_i32_3 = arith.constant 0 : i32
    return %c0_i32, %c0_i32_0, %c0_i32_1, %c0_i32_2 : i32, i32, i32, i32
  }
  func.func @transform_3(%arg0: i32, %arg1: i32) -> (i32, i32) {
    %c0_i32 = arith.constant 0 : i32
    %c0_i32_0 = arith.constant 0 : i32
    %c0_i32_1 = arith.constant 0 : i32
    return %c0_i32, %c0_i32_0 : i32, i32
  }
  func.func @transform_4(%arg0: i32, %arg1: i32) -> (i32, i32, i32, i32, i32) {
    %c0_i32 = arith.constant 0 : i32
    %c0_i32_0 = arith.constant 0 : i32
    %c0_i32_1 = arith.constant 0 : i32
    %c0_i32_2 = arith.constant 0 : i32
    return %arg0, %arg1, %c0_i32, %c0_i32_0, %c0_i32_1 : i32, i32, i32, i32, i32
  }
}

</mosaic_0001>

<bundles_post_ra>
// kernel: tpu_custom_call.1
= control target key start
LH: loop header
LB: loop body
LE: loop exit
PB: predicated region body
PF: predicated region fallthrough
CT: control target
= control target key end

     0   :  { %s2054_s15 = smov 0   ;;  %s2056_s16 = smov 0   ;;  %s2517_s0 = inlined_call_operand.vmem [shape: bf16[2,18,18,4], index: 0, kind: input, shape index: {}]   ;;  %s2518_s1 = inlined_call_operand.vmem [shape: bf16[2,18,18,4], index: 1, kind: input, shape index: {}]   ;;  %s2519_s2 = inlined_call_operand.vmem [shape: bf16[2,2,12,8], index: 2, kind: input, shape index: {}]   ;;  %s2520_s3 = inlined_call_operand.vmem [shape: f32[1,8], index: 3, kind: input, shape index: {}]   ;;  %s2521_s4 = inlined_call_operand.vmem [shape: f32[2,16,2,16,8], index: 4, kind: output, shape index: {}]  }
   0x1   :  { %s2058_s17 = smov 0   ;;  %s2060_s18 = smov 0  }
   0x2   :  { %s2062_s19 = smov 0  }
   0x3 LB: > { %s23_s20 = sadd.s32 1, %s2017_s17  ;;  %s26_s21 = sadd.s32 1, %s2021_s18  ;;  %s2025_s19 = sphi %s2062_s19, %s14_s19   ;;  %s2021_s18 = sphi %s2060_s18, %s2530_s18   ;;  %s2017_s17 = sphi %s2058_s17, %s2529_s17   ;;  %s2013_s16 = sphi %s2056_s16, %s2528_s16   ;;  %s2009_s15 = sphi %s2054_s15, %s2527_s15  }
   0x4   : > { %p24_p0 = scmp.ge.s32.totalorder %s23_s20, 2  ;;  %p1664_p1 = scmp.ge.s32.totalorder %s2025_s19, 1 }
   0x5   : > { %p220_p2 = scmp.lt.s32.totalorder %s2025_s19, 5 }
   0x6   : > { %s2532_s20 = smov (%p24_p0, %s23_s20), 0  ;;  %s2534_s21 = smov (!%p24_p0, %s26_s21), %s2021_s18 }
   0x7   : > { %p221_p3 = pnand %p1664_p1, %p220_p2  ;;  %p28_p4 = scmp.ge.s32.totalorder %s2534_s21, 2 }
   0x8   : > { %s2084_s22 = sshll.u32 (!%p221_p3), %s2009_s15, 3  ;;  %p279_p5 = scmp.lt.s32.totalorder (!%p221_p3), %s2013_s16, 1  ;;  %vm436_vm0 = vsmask.f32 (!%p221_p3), 3328  ;;  %vm437_vm1 = vsmask.f32 (!%p221_p3), 7440 }
   0x9   : > { %s2536_s21 = smov (%p28_p4, %s2534_s21), 0  ;;  %224 = sbr.rel (%p221_p3) target bundleno = 459 (0x1cb), region = 36 }
   0xa   : > { %p281_p6 = scmp.lt.s32.totalorder (!%p221_p3), %s2084_s22, 17  ;;  %vm804_vm2 = vcmask (!%p221_p3), 1042432   ;;  %vm805_vm3 = vcmask (!%p221_p3), 1046532   ;;  %vm2116_vm5 = vmor (!%p221_p3), %vm436_vm0, %vm437_vm1  ;;  %vm385_vm6 = vcmask (!%p221_p3), 31744   ;;  %s1783_s5 = sadd.s32 (!%p221_p3), 8, %s2084_s22  ;;  %vm1005_vm7 = vcmask (!%p221_p3), 1045504  }
   0xb   : > { %vm2106_vm4 = vmor (!%p221_p3), %vm804_vm2, %vm805_vm3  ;;  %p2136_p7 = scmp.lt.s32.totalorder (!%p221_p3), %s1783_s5, 17  ;;  %s2027_s7 = smov (!%p221_p3), 8   ;;  %vm679_vm8 = vcmask (!%p221_p3), 64544   ;;  %vm911_vm9 = vcmask (!%p221_p3), 97344   ;;  %vm980_vm10 = vcmask (!%p221_p3), 97280   ;;  %vm1236_vm11 = vcmask (!%p221_p3), 64512  }
   0xc   : > { %s2028_s8 = smov (!%p221_p3), 4   ;;  %p312_p8 = scmp.lt.s32.totalorder (!%p221_p3), %s2084_s22, 15 }
  0x10   : > { %s2538_s16 = smov (!%p279_p5, %s2013_s16), 1  ;;  %s2540_s5 = smov (!%p2136_p7, %s1783_s5), 17 }
  0x11   : > { %s282_s23 = scalar_select %p281_p6, %s2084_s22, 17 }
  0x12   : > { %s1929_s24 = smul.u32 54, %s2538_s16  ;;  %s2542_s22 = smov (!%p312_p8, %s2084_s22), 15 }
  0x13   : > { %s1928_s25 = smul.u32 3, %s282_s23 }
  0x14   : > { %s1930_s9 = smul.u32 3, %s2540_s5  ;;  %s1672_s5 = sshll.u32 %s2538_s16, 6 }
  0x15   : > { %s285_s26 = sadd.s32 %s1929_s24, %s1928_s25 }
  0x16   : > { %s1666_s27 = sshll.u32 %s285_s26, 2  ;;  %s2205_s10 = sadd.s32 %s1930_s9, %s1929_s24 }
  0x17   : > { %s2096_s30 = scalar_lea.vmem %s2517_s0, %s1666_s27  ;;  %s1669_s11 = sshll.u32 %s2205_s10, 2 }
  0x18   : > { %v415_v0 = vld [vmem:[%s2096_s30 + $0xc] sm:$0xf]  ;;  %v416_v1 = vld [vmem:[%s2096_s30 + $0x10] sm:$0xf]  ;;  %v417_v2 = vld [vmem:[%s2096_s30 + $0x14] sm:$0x1]  ;;  %s2235_s14 = scalar_lea.vmem %s2518_s1, %s1669_s11 }
  0x19   : > { %v464_v3 = vshrl.u32 %v415_v0, 16  ;;  %v467_v4 = vshll.u32 %v415_v0, 16  ;;  %v473_v5 = vshll.u32 %v416_v1, 16  ;;  %v477_v6 = vshrl.u32 %v416_v1, 16  ;;  %v759_v7 = vld [vmem:[%s2096_s30 + $0xc] sm:$0xe] }
  0x1a   : > { %v483_v8 = vshll.u32 %v417_v2, 16  ;;  %v760_v9 = vld [vmem:[%s2096_s30 + $0x10] sm:$0xf]  ;;  %v761_v10 = vld [vmem:[%s2096_s30 + $0x14] sm:$0x1]  ;;  %v1695_v11 = vrot.slane %v759_v7, 9 }
  0x1b   : > { %v466_v12 = vrot.slane %v464_v3, 4  ;;  %v469_v13 = vrot.slane %v467_v4, 5  ;;  %v475_v14 = vrot.slane %v473_v5, 5  ;;  %v479_v15 = vrot.slane %v477_v6, 4  ;;  %v418_v17 = vld [vmem:[%s2096_s30 + $0x18] sm:$0xf] }
  0x1c   : > { %v485_v18 = vrot.slane %v483_v8, 5  ;;  %v816_v19 = vrot.slane %v760_v9, 5  ;;  %v819_v20 = vrot.slane %v761_v10, 5  ;;  %v419_v21 = vld [vmem:[%s2096_s30 + $0x1c] sm:$0xf]  ;;  %v488_v22 = vshrl.u32 %v418_v17, 16 }
  0x1d   : > { %v470_v23 = vor.u32 %v469_v13, %v466_v12  ;;  %v480_v24 = vor.u32 %v479_v15, %v475_v14  ;;  %v420_v25 = vld [vmem:[%s2096_s30 + $0x20] sm:$0x1]  ;;  %v491_v26 = vshll.u32 %v418_v17, 16  ;;  %v497_v27 = vshll.u32 %v419_v21, 16  ;;  %v421_v28 = vld [vmem:[%s2096_s30 + $0x24] sm:$0xf] }
  0x1e   : > { %v817_v30 = vsel %vm2106_vm4, %v1695_v11, %v816_v19  ;;  %v818_v31 = vrot.slane %v816_v19, 4  ;;  %v490_v32 = vrot.slane %v488_v22, 4  ;;  %v501_v33 = vshrl.u32 %v419_v21, 16  ;;  %v422_v41 = vld [vmem:[%s2096_s30 + $0x28] sm:$0xf]  ;;  %v1973_v15 = vld [vmem:[%s2096_s30 + $0xc] sm:$0xff]  }
  0x1f   : > { %v471_v34 = vrot.slane %v470_v23, 4  ;;  %v481_v35 = vrot.slane %v480_v24, 4  ;;  %v493_v36 = vrot.slane %v491_v26, 5  ;;  %v499_v37 = vrot.slane %v497_v27, 5  ;;  %v423_v47 = vld [vmem:[%s2096_s30 + $0x2c] sm:$0x1] }
  0x20   : > { %v820_v38 = vsel %vm2106_vm4, %v818_v31, %v819_v20  ;;  %v503_v39 = vrot.slane %v501_v33, 4  ;;  %v507_v40 = vshll.u32 %v420_v25, 16  ;;  %v512_v42 = vshrl.u32 %v421_v28, 16  ;;  %v762_v48 = vld [vmem:[%s2096_s30 + $0x18] sm:$0xe]  ;;  %387 = vst.msk [vmem:[#allocation2 + $0x8] sm:$0xff] %vm385_vm6, %v1973_v15 }
  0x21   : > { %v476_v43 = vsel %vm2116_vm5, %v471_v34, %v475_v14  ;;  %v486_v44 = vsel %vm2116_vm5, %v481_v35, %v485_v18  ;;  %v1703_v45 = vcombine.low %v817_v30, %v820_v38  ;;  %v494_v46 = vor.u32 %v493_v36, %v490_v32  ;;  %v763_v49 = vld [vmem:[%s2096_s30 + $0x1c] sm:$0xf]  ;;  %v764_v54 = vld [vmem:[%s2096_s30 + $0x20] sm:$0x1]  ;;  %v765_v59 = vld [vmem:[%s2096_s30 + $0x24] sm:$0xe] }
  0x22   : > { %v1685_v50 = vcombine.low %v476_v43, %v486_v44  ;;  %v504_v51 = vor.u32 %v503_v39, %v499_v37  ;;  %v509_v52 = vrot.slane %v507_v40, 5  ;;  %v514_v53 = vrot.slane %v512_v42, 4  ;;  %v766_v60 = vld [vmem:[%s2096_s30 + $0x28] sm:$0xf]  ;;  %v767_v1 = vld [vmem:[%s2096_s30 + $0x2c] sm:$0x1] }
  0x23   : > { %889 = vrot.lane.b32.xlu1 %v1703_v45, %s2027_s7  ;;  %v495_v55 = vrot.slane %v494_v46, 4  ;;  %v515_v56 = vshll.u32 %v421_v28, 16  ;;  %v521_v57 = vshll.u32 %v422_v41, 16  ;;  %v525_v58 = vshrl.u32 %v422_v41, 16  ;;  %v424_v6 = vld [vmem:[%s2096_s30 + $0x30] sm:$0xf] }
  0x24   : > { %657 = vrot.lane.b32.xlu0 %v1685_v50, %s2028_s8  ;;  %v505_v61 = vrot.slane %v504_v51, 4  ;;  %v531_v62 = vshll.u32 %v423_v47, 16  ;;  %v1696_v63 = vrot.slane %v762_v48, 9  ;;  %v823_v0 = vrot.slane %v763_v49, 5  ;;  %v425_v20 = vld [vmem:[%s2096_s30 + $0x34] sm:$0xf] }
  0x25   : > { %v500_v2 = vsel %vm2116_vm5, %v495_v55, %v499_v37  ;;  %v517_v3 = vrot.slane %v515_v56, 5  ;;  %v523_v4 = vrot.slane %v521_v57, 5  ;;  %v527_v5 = vrot.slane %v525_v58, 4  ;;  %v426_v25 = vld [vmem:[%s2096_s30 + $0x38] sm:$0x1] }
  0x26   : > { %v510_v7 = vsel %vm2116_vm5, %v505_v61, %v509_v52  ;;  %v533_v8 = vrot.slane %v531_v62, 5  ;;  %v824_v9 = vsel %vm2106_vm4, %v1696_v63, %v823_v0  ;;  %v825_v10 = vrot.slane %v823_v0, 4  ;;  %v1974_v27 = vld [vmem:[%s2096_s30 + $0x18] sm:$0xff]   ;;  %v428_v38 = vld [vmem:[%s2096_s30 + $0x40] sm:$0xf] }
  0x27   : > { %v1686_v11 = vcombine.low %v500_v2, %v510_v7  ;;  %v518_v12 = vor.u32 %v517_v3, %v514_v53  ;;  %v528_v13 = vor.u32 %v527_v5, %v523_v4  ;;  %v826_v14 = vrot.slane %v764_v54, 5  ;;  %v427_v33 = vld [vmem:[%s2096_s30 + $0x3c] sm:$0xf]  ;;  %388 = vst.msk [vmem:[#allocation2 + $0x10] sm:$0xff] %vm385_vm6, %v1974_v27  ;;  %v429_v43 = vld [vmem:[%s2096_s30 + $0x44] sm:$0x1] }
  0x28   : > { %v1697_v17 = vrot.slane %v765_v59, 9  ;;  %v830_v18 = vrot.slane %v766_v60, 5  ;;  %v833_v19 = vrot.slane %v767_v1, 5  ;;  %v536_v21 = vshrl.u32 %v424_v6, 16  ;;  %v768_v44 = vld [vmem:[%s2096_s30 + $0x30] sm:$0xe] }
  0x29   : > { %659 = vrot.lane.b32.xlu0 %v1686_v11, %s2028_s8  ;;  %v519_v22 = vrot.slane %v518_v12, 4  ;;  %v529_v23 = vrot.slane %v528_v13, 4  ;;  %v827_v24 = vsel %vm2106_vm4, %v825_v10, %v826_v14  ;;  %v539_v26 = vshll.u32 %v424_v6, 16  ;;  %v769_v49 = vld [vmem:[%s2096_s30 + $0x34] sm:$0xf]  ;;  %v1975_v2 = vld [vmem:[%s2096_s30 + $0x24] sm:$0xff]  }
  0x2a   : > { %v1704_v28 = vcombine.low %v824_v9, %v827_v24  ;;  %v831_v30 = vsel %vm2106_vm4, %v1697_v17, %v830_v18  ;;  %v832_v31 = vrot.slane %v830_v18, 4  ;;  %v538_v32 = vrot.slane %v536_v21, 4  ;;  %v770_v50 = vld [vmem:[%s2096_s30 + $0x38] sm:$0x1]  ;;  %v771_v55 = vld [vmem:[%s2096_s30 + $0x3c] sm:$0xe] }
  0x2b   : > { %v524_v34 = vsel %vm2116_vm5, %v519_v22, %v523_v4  ;;  %v534_v35 = vsel %vm2116_vm5, %v529_v23, %v533_v8  ;;  %v541_v36 = vrot.slane %v539_v26, 5  ;;  %v545_v37 = vshll.u32 %v425_v20, 16  ;;  %v772_v60 = vld [vmem:[%s2096_s30 + $0x40] sm:$0xf]  ;;  %v773_v1 = vld [vmem:[%s2096_s30 + $0x44] sm:$0x1] }
  0x2c   : > { %v1687_v39 = vcombine.low %v524_v34, %v534_v35  ;;  %v834_v40 = vsel %vm2106_vm4, %v832_v31, %v833_v19  ;;  %v549_v41 = vshrl.u32 %v425_v20, 16  ;;  %v555_v42 = vshll.u32 %v426_v25, 16  ;;  %v430_v7 = vld [vmem:[%s2096_s30 + $0x48] sm:$0xf]  ;;  %v1976_v8 = vld [vmem:[%s2096_s30 + $0x30] sm:$0xff]   ;;  %389 = vst.msk [vmem:[#allocation2 + $0x18] sm:$0xff] %vm385_vm6, %v1975_v2 }
  0x2d   : > { %891 = vrot.lane.b32.xlu0 %v1704_v28, %s2027_s7  ;;  %v1705_v45 = vcombine.low %v831_v30, %v834_v40  ;;  %v542_v46 = vor.u32 %v541_v36, %v538_v32  ;;  %v547_v47 = vrot.slane %v545_v37, 5  ;;  %v560_v48 = vshrl.u32 %v427_v33, 16  ;;  %v1979_v13 = vld [vmem:[%s2096_s30 + $0x3c] sm:$0xff]   ;;  %390 = vst.msk [vmem:[#allocation2 + $0x20] sm:$0xff] %vm385_vm6, %v1976_v8  ;;  %v431_v22 = vld [vmem:[%s2096_s30 + $0x4c] sm:$0xf] }
  0x2e   : > { %661 = vrot.lane.b32.xlu1 %v1687_v39, %s2028_s8  ;;  %v551_v51 = vrot.slane %v549_v41, 4  ;;  %v557_v52 = vrot.slane %v555_v42, 5  ;;  %v563_v53 = vshll.u32 %v427_v33, 16  ;;  %v569_v54 = vshll.u32 %v428_v38, 16  ;;  %391 = vst.msk [vmem:[#allocation2 + $0x28] sm:$0xff] %vm385_vm6, %v1979_v13  ;;  %v1982_v24 = vld [vmem:[%s2096_s30 + $0x48] sm:$0xff]  }
  0x2f   : > { %v543_v56 = vrot.slane %v542_v46, 4  ;;  %v562_v57 = vrot.slane %v560_v48, 4  ;;  %v573_v58 = vshrl.u32 %v428_v38, 16  ;;  %v579_v59 = vshll.u32 %v429_v43, 16  ;;  %v432_v30 = vld [vmem:[%s2096_s30 + $0x50] sm:$0x1] }
  0x30   : > { %v552_v61 = vor.u32 %v551_v51, %v547_v47  ;;  %v565_v62 = vrot.slane %v563_v53, 5  ;;  %v571_v63 = vrot.slane %v569_v54, 5  ;;  %v1698_v0 = vrot.slane %v768_v44, 9  ;;  %v433_v31 = vld [vmem:[%s2096_s30 + $0x54] sm:$0xf]  ;;  %392 = vst.msk [vmem:[#allocation2 + $0x30] sm:$0xff] %vm385_vm6, %v1982_v24 }
  0x31   : > { %v548_v3 = vsel %vm2116_vm5, %v543_v56, %v547_v47  ;;  %v575_v4 = vrot.slane %v573_v58, 4  ;;  %v581_v5 = vrot.slane %v579_v59, 5  ;;  %v837_v6 = vrot.slane %v769_v49, 5  ;;  %v434_v40 = vld [vmem:[%s2096_s30 + $0x58] sm:$0xf] }
  0x32   : > { %893 = vrot.lane.b32.xlu1 %v1705_v45, %s2027_s7  ;;  %v553_v9 = vrot.slane %v552_v61, 4  ;;  %v566_v10 = vor.u32 %v565_v62, %v562_v57  ;;  %v840_v11 = vrot.slane %v770_v50, 5  ;;  %v1699_v12 = vrot.slane %v771_v55, 9  ;;  %v435_v44 = vld [vmem:[%s2096_s30 + $0x5c] sm:$0x1] }
  0x33   : > { %v576_v14 = vor.u32 %v575_v4, %v571_v63  ;;  %v838_v15 = vsel %vm2106_vm4, %v1698_v0, %v837_v6  ;;  %v839_v17 = vrot.slane %v837_v6, 4  ;;  %v844_v18 = vrot.slane %v772_v60, 5  ;;  %v774_v46 = vld [vmem:[%s2096_s30 + $0x48] sm:$0xe]  ;;  %v775_v51 = vld [vmem:[%s2096_s30 + $0x4c] sm:$0xf] }
  0x34   : > { %v558_v19 = vsel %vm2116_vm5, %v553_v9, %v557_v52  ;;  %v567_v20 = vrot.slane %v566_v10, 4  ;;  %v847_v21 = vrot.slane %v773_v1, 5  ;;  %v584_v23 = vshrl.u32 %v430_v7, 16  ;;  %v1983_v52 = vld [vmem:[%s2096_s30 + $0x54] sm:$0xff]   ;;  %v776_v61 = vld [vmem:[%s2096_s30 + $0x50] sm:$0x1] }
  0x35   : > { %v1688_v25 = vcombine.low %v548_v3, %v558_v19  ;;  %v577_v26 = vrot.slane %v576_v14, 4  ;;  %v841_v27 = vsel %vm2106_vm4, %v839_v17, %v840_v11  ;;  %v845_v28 = vsel %vm2106_vm4, %v1699_v12, %v844_v18  ;;  %393 = vst.msk [vmem:[#allocation2 + $0x38] sm:$0xff] %vm385_vm6, %v1983_v52  ;;  %v777_v2 = vld [vmem:[%s2096_s30 + $0x54] sm:$0xe]  ;;  %v779_v12 = vld [vmem:[%s2096_s30 + $0x5c] sm:$0x1] }
  0x36   : > { %v572_v32 = vsel %vm2116_vm5, %v567_v20, %v571_v63  ;;  %v1706_v33 = vcombine.low %v838_v15, %v841_v27  ;;  %v846_v34 = vrot.slane %v844_v18, 4  ;;  %v586_v35 = vrot.slane %v584_v23, 4  ;;  %v688_v13 = vld [vmem:[%s2235_s14] sm:$0xf]  ;;  %v689_v19 = vld [vmem:[%s2235_s14 + $0x4] sm:$0xf] }
  0x37   : > { %663 = vrot.lane.b32.xlu0 %v1688_v25, %s2028_s8  ;;  %v582_v36 = vsel %vm2116_vm5, %v577_v26, %v581_v5  ;;  %v587_v37 = vshll.u32 %v430_v7, 16  ;;  %v593_v38 = vshll.u32 %v431_v22, 16  ;;  %v597_v39 = vshrl.u32 %v431_v22, 16  ;;  %v778_v7 = vld [vmem:[%s2096_s30 + $0x58] sm:$0xf] }
  0x38   : > { %v1689_v41 = vcombine.low %v572_v32, %v582_v36  ;;  %v848_v42 = vsel %vm2106_vm4, %v846_v34, %v847_v21  ;;  %v603_v43 = vshll.u32 %v432_v30, 16  ;;  %v608_v45 = vshrl.u32 %v433_v31, 16  ;;  %v690_v20 = vld [vmem:[%s2235_s14 + $0x8] sm:$0x1]  ;;  %v1984_v21 = vld [vmem:[%s2235_s14] sm:$0xff]  }
  0x39   : > { %v1707_v47 = vcombine.low %v845_v28, %v848_v42  ;;  %v589_v48 = vrot.slane %v587_v37, 5  ;;  %v595_v49 = vrot.slane %v593_v38, 5  ;;  %v599_v50 = vrot.slane %v597_v39, 4  ;;  %v691_v26 = vld [vmem:[%s2235_s14 + $0xc] sm:$0xf]  ;;  %410 = vst.msk [vmem:[#allocation2 + $0x40] sm:$0xff] %vm385_vm6, %v1984_v21 }
  0x3a   : > { %665 = vrot.lane.b32.xlu1 %v1689_v41, %s2028_s8  ;;  %v605_v53 = vrot.slane %v603_v43, 5  ;;  %v610_v54 = vrot.slane %v608_v45, 4  ;;  %v611_v55 = vshll.u32 %v433_v31, 16  ;;  %v617_v56 = vshll.u32 %v434_v40, 16  ;;  %v692_v32 = vld [vmem:[%s2235_s14 + $0x10] sm:$0xf] }
  0x3b   : > { %895 = vrot.lane.b32.xlu0 %v1706_v33, %s2027_s7  ;;  %v590_v57 = vor.u32 %v589_v48, %v586_v35  ;;  %v600_v58 = vor.u32 %v599_v50, %v595_v49  ;;  %v621_v59 = vshrl.u32 %v434_v40, 16  ;;  %v627_v60 = vshll.u32 %v435_v44, 16  ;;  %v1985_v33 = vld [vmem:[%s2235_s14 + $0xc] sm:$0xff]   ;;  %v693_v38 = vld [vmem:[%s2235_s14 + $0x14] sm:$0x1]  ;;  %v1986_v21 = vld [vmem:[%s2096_s30] sm:$0xff]  }
  0x3c   : > { %v613_v62 = vrot.slane %v611_v55, 5  ;;  %v619_v63 = vrot.slane %v617_v56, 5  ;;  %v1700_v0 = vrot.slane %v774_v46, 9  ;;  %v851_v1 = vrot.slane %v775_v51, 5  ;;  %v920_v43 = vld [vmem:[%s2235_s14] sm:$0xe] }
  0x3d   : > { %v591_v3 = vrot.slane %v590_v57, 4  ;;  %v601_v4 = vrot.slane %v600_v58, 4  ;;  %v623_v5 = vrot.slane %v621_v59, 4  ;;  %v629_v6 = vrot.slane %v627_v60, 5  ;;  %411 = vst.msk [vmem:[#allocation2 + $0x48] sm:$0xff] %vm385_vm6, %v1985_v33  ;;  %386 = vst.msk [vmem:[#allocation2] sm:$0xff] %vm385_vm6, %v1986_v21 }
  0x3e   : > { %897 = vrot.lane.b32.xlu1 %v1707_v47, %s2027_s7  ;;  %v614_v8 = vor.u32 %v613_v62, %v610_v54  ;;  %v852_v9 = vsel %vm2106_vm4, %v1700_v0, %v851_v1  ;;  %v853_v10 = vrot.slane %v851_v1, 4  ;;  %v854_v11 = vrot.slane %v776_v61, 5  ;;  %v921_v48 = vld [vmem:[%s2235_s14 + $0x4] sm:$0xf]  ;;  %v923_v58 = vld [vmem:[%s2235_s14 + $0xc] sm:$0xe] }
  0x3f   : > { %v596_v14 = vsel %vm2116_vm5, %v591_v3, %v595_v49  ;;  %v606_v15 = vsel %vm2116_vm5, %v601_v4, %v605_v53  ;;  %v624_v17 = vor.u32 %v623_v5, %v619_v63  ;;  %v1701_v18 = vrot.slane %v777_v2, 9  ;;  %v922_v53 = vld [vmem:[%s2235_s14 + $0x8] sm:$0x1]  ;;  %v925_v0 = vld [vmem:[%s2235_s14 + $0x14] sm:$0x1] }
  0x40   : > { %v1690_v22 = vcombine.low %v596_v14, %v606_v15  ;;  %v615_v23 = vrot.slane %v614_v8, 4  ;;  %v855_v24 = vsel %vm2106_vm4, %v853_v10, %v854_v11  ;;  %v858_v25 = vrot.slane %v778_v7, 5  ;;  %v413_v14 = vld [vmem:[%s2096_s30 + $0x4] sm:$0xf]  ;;  %v758_v33 = vld [vmem:[%s2096_s30 + $0x8] sm:$0x1] }
  0x41   : > { %v625_v27 = vrot.slane %v624_v17, 4  ;;  %v1708_v28 = vcombine.low %v852_v9, %v855_v24  ;;  %v861_v30 = vrot.slane %v779_v12, 5  ;;  %v695_v31 = vshrl.u32 %v688_v13, 16  ;;  %v412_v9 = vld [vmem:[%s2096_s30] sm:$0xf] }
  0x42   : > { %667 = vrot.lane.b32.xlu0 %v1690_v22, %s2028_s8  ;;  %v620_v34 = vsel %vm2116_vm5, %v615_v23, %v619_v63  ;;  %v859_v35 = vsel %vm2106_vm4, %v1701_v18, %v858_v25  ;;  %v860_v36 = vrot.slane %v858_v25, 4  ;;  %v698_v37 = vshll.u32 %v688_v13, 16  ;;  %v924_v63 = vld [vmem:[%s2235_s14 + $0x10] sm:$0xf] }
  0x43   : > { %v630_v39 = vsel %vm2116_vm5, %v625_v27, %v629_v6  ;;  %v697_v40 = vrot.slane %v695_v31, 4  ;;  %v704_v41 = vshll.u32 %v689_v19, 16  ;;  %v708_v42 = vshrl.u32 %v689_v19, 16 }
  0x44   : > { %v1691_v44 = vcombine.low %v620_v34, %v630_v39  ;;  %v862_v45 = vsel %vm2106_vm4, %v860_v36, %v861_v30  ;;  %v700_v46 = vrot.slane %v698_v37, 5  ;;  %v714_v47 = vshll.u32 %v690_v20, 16  ;;  %v414_v20 = vld [vmem:[%s2096_s30 + $0x8] sm:$0x1]  ;;  %v1978_v39 = vld [vmem:[%s2519_s2 + $0x18] sm:$0x3f]  }
  0x45   : > { %v1709_v49 = vcombine.low %v859_v35, %v862_v45  ;;  %v706_v50 = vrot.slane %v704_v41, 5  ;;  %v710_v51 = vrot.slane %v708_v42, 4  ;;  %v719_v52 = vshrl.u32 %v691_v26, 16  ;;  %1926 = vmatprep.subr.msk.bf16.mxu1 %vm1005_vm7, %v1978_v39 }
  0x46   : > { %669 = vrot.lane.b32.xlu1 %v1691_v44, %s2028_s8  ;;  %899 = vrot.lane.b32.xlu0 %v1708_v28, %s2027_s7  ;;  %v701_v54 = vor.u32 %v700_v46, %v697_v40  ;;  %v716_v55 = vrot.slane %v714_v47, 5  ;;  %v722_v56 = vshll.u32 %v691_v26, 16  ;;  %v728_v57 = vshll.u32 %v692_v32, 16  ;;  %v756_v26 = vld [vmem:[%s2096_s30] sm:$0xe] }
  0x47   : > { %v711_v59 = vor.u32 %v710_v51, %v706_v50  ;;  %v721_v60 = vrot.slane %v719_v52, 4  ;;  %v732_v61 = vshrl.u32 %v692_v32, 16  ;;  %v738_v62 = vshll.u32 %v693_v38, 16  ;;  %v757_v32 = vld [vmem:[%s2096_s30 + $0x4] sm:$0xf]  ;;  %s1671_s30 = sshll.u32 %s2542_s22, 2 }
  0x48   : > { %v702_v1 = vrot.slane %v701_v54, 4  ;;  %v724_v2 = vrot.slane %v722_v56, 5  ;;  %v730_v3 = vrot.slane %v728_v57, 5  ;;  %v1710_v4 = vrot.slane %v920_v43, 9  ;;  %v1977_v38 = vld [vmem:[%s2519_s2 + $0x8] sm:$0x3f]   ;;  %s316_s6 = sadd.s32 %s1672_s5, %s1671_s30 }
  0x49   : > { %v712_v5 = vrot.slane %v711_v59, 4  ;;  %v734_v6 = vrot.slane %v732_v61, 4  ;;  %v740_v7 = vrot.slane %v738_v62, 5  ;;  %v934_v8 = vrot.slane %v921_v48, 5  ;;  %v1980_v51 = vld [vmem:[%s2519_s2] sm:$0x3f]   ;;  %1924 = vmatprep.subr.msk.bf16.mxu0 %vm1005_vm7, %v1977_v38 }
  0x4a   : > { %901 = vrot.lane.b32.xlu1 %v1709_v49, %s2027_s7  ;;  %v707_v10 = vsel %vm2116_vm5, %v702_v1, %v706_v50  ;;  %v725_v11 = vor.u32 %v724_v2, %v721_v60  ;;  %v937_v12 = vrot.slane %v922_v53, 5  ;;  %v1711_v13 = vrot.slane %v923_v58, 9  ;;  %v1981_v52 = vld [vmem:[%s2519_s2 + $0x10] sm:$0x3f]  }
  0x4b   : > { %v717_v15 = vsel %vm2116_vm5, %v712_v5, %v716_v55  ;;  %v735_v17 = vor.u32 %v734_v6, %v730_v3  ;;  %v935_v18 = vsel %vm2106_vm4, %v1710_v4, %v934_v8  ;;  %v936_v19 = vrot.slane %v934_v8, 4 }
  0x4c   : > { %v1692_v22 = vcombine.low %v707_v10, %v717_v15  ;;  %v726_v23 = vrot.slane %v725_v11, 4  ;;  %v941_v24 = vrot.slane %v924_v63, 5  ;;  %v944_v25 = vrot.slane %v925_v0, 5 }
  0x4d   : > { %v736_v27 = vrot.slane %v735_v17, 4  ;;  %v938_v28 = vsel %vm2106_vm4, %v936_v19, %v937_v12  ;;  %v440_v30 = vshrl.u32 %v412_v9, 16  ;;  %v443_v31 = vshll.u32 %v412_v9, 16 }
  0x4e   : > { %748 = vrot.lane.b32.xlu0 %v1692_v22, %s2028_s8  ;;  %v731_v34 = vsel %vm2116_vm5, %v726_v23, %v730_v3  ;;  %v1712_v35 = vcombine.low %v935_v18, %v938_v28  ;;  %v942_v36 = vsel %vm2106_vm4, %v1711_v13, %v941_v24  ;;  %v943_v37 = vrot.slane %v941_v24, 4 }
  0x4f   : > { %v741_v40 = vsel %vm2116_vm5, %v736_v27, %v740_v7  ;;  %v442_v41 = vrot.slane %v440_v30, 4  ;;  %v445_v42 = vrot.slane %v443_v31, 5  ;;  %v449_v43 = vshll.u32 %v413_v14, 16 }
  0x50   : > { %v1693_v44 = vcombine.low %v731_v34, %v741_v40  ;;  %v945_v45 = vsel %vm2106_vm4, %v943_v37, %v944_v25  ;;  %v453_v46 = vshrl.u32 %v413_v14, 16  ;;  %v459_v47 = vshll.u32 %v414_v20, 16 }
  0x51   : > { %v446_v48 = vor.u32 %v445_v42, %v442_v41  ;;  %v451_v49 = vrot.slane %v449_v43, 5  ;;  %v1694_v50 = vrot.slane %v756_v26, 9  ;;  %v1713_v53 = vcombine.low %v942_v36, %v945_v45 }
  0x52   : > { %750 = vrot.lane.b32.xlu1 %v1693_v44, %s2028_s8  ;;  %952 = vrot.lane.b32.xlu0 %v1712_v35, %s2027_s7  ;;  %v455_v54 = vrot.slane %v453_v46, 4  ;;  %v809_v55 = vrot.slane %v757_v32, 5  ;;  %v812_v56 = vrot.slane %v758_v33, 5  ;;  %v461_v58 = vrot.slane %v459_v47, 5 }
  0x53   : > { %v447_v57 = vrot.slane %v446_v48, 4  ;;  %v1007_v62 = vsel %vm1005_vm7, %v1977_v38, 0  ;;  %v1298_v63 = vsel %vm1005_vm7, %v1978_v39, 0  ;;  %v1115_v0 = vsel %vm1005_vm7, %v1980_v51, 0  ;;  %v2399_v38 = vld [vmem:[%s2520_s3] ss:$0 sm:$0xff] }
  0x54   : > { %v456_v59 = vor.u32 %v455_v54, %v451_v49  ;;  %v810_v60 = vsel %vm2106_vm4, %v1694_v50, %v809_v55  ;;  %v811_v61 = vrot.slane %v809_v55, 4  ;;  %1821 = vmatpush3.bf16.msra.mxu0 %v1007_v62  ;;  %v1406_v1 = vsel %vm1005_vm7, %v1981_v52, 0  ;;  %1857 = vmatpush3.bf16.msra.mxu1 %v1298_v63 }
  0x55   : > { %v452_v2 = vsel %vm2116_vm5, %v447_v57, %v451_v49  ;;  %1925 = vmatprep.subr.msk.bf16.mxu0 %vm1005_vm7, %v1980_v51  ;;  %1927 = vmatprep.subr.msk.bf16.mxu1 %vm1005_vm7, %v1981_v52 }
  0x56   : > { %954 = vrot.lane.b32.xlu1 %v1713_v53, %s2027_s7  ;;  %v457_v3 = vrot.slane %v456_v59, 4  ;;  %v813_v4 = vsel %vm2106_vm4, %v811_v61, %v812_v56 }
  0x57   : > { %v1702_v5 = vcombine.low %v810_v60, %v813_v4 }
  0x58   : > { %v462_v6 = vsel %vm2116_vm5, %v457_v3, %v461_v58 }
  0x59   : > { %v1684_v7 = vcombine.low %v452_v2, %v462_v6 }
  0x5a   : > { %887 = vrot.lane.b32.xlu1 %v1702_v5, %s2027_s7  ;;  %s1673_s7 = sshll.u32 %s316_s6, 3 }
  0x5b   : > { %655 = vrot.lane.b32.xlu0 %v1684_v7, %s2028_s8  ;;  %s2404_s12 = scalar_lea.vmem %s2521_s4, %s1673_s7 }
  0x95   : > { %v890_v8 = vpop.permute.xlu1 %889 }
  0x96   : > { %v658_v9 = vpop.permute.xlu0 %657 }
  0x97   : > { %681 = vst.msk [vmem:[#allocation2 + $0x8] sm:$0xff] %vm679_vm8, %v658_v9 }
  0x98   : > { %913 = vst.msk [vmem:[#allocation2 + $0x8] sm:$0xff] %vm911_vm9, %v890_v8 }
  0x9b   : > { %v660_v16 = vpop.permute.xlu0 %659 }
  0x9c   : > { %682 = vst.msk [vmem:[#allocation2 + $0x10] sm:$0xff] %vm679_vm8, %v660_v16 }
  0x9f   : > { %v892_v10 = vpop.permute.xlu0 %891  ;;  %v2339_v29 = vld [vmem:[#allocation2 + $0x8] sm:$0xff] }
  0xa0   : > { %v662_v11 = vpop.permute.xlu1 %661  ;;  %914 = vst.msk [vmem:[#allocation2 + $0x10] sm:$0xff] %vm911_vm9, %v892_v10  ;;  %1822 = vmatprep.mubr.msk.bf16.mxu0 %vm980_vm10, %v2339_v29 }
  0xa1   : > { %683 = vst.msk [vmem:[#allocation2 + $0x18] sm:$0xff] %vm679_vm8, %v662_v11 }
  0xa4   : > { %v894_v12 = vpop.permute.xlu1 %893 }
  0xa5   : > { %915 = vst.msk [vmem:[#allocation2 + $0x18] sm:$0xff] %vm911_vm9, %v894_v12 }
  0xa7   : > { %v963_v13 = vld [vmem:[#allocation2 + $0x10] sm:$0xff] }
  0xa8   : > { %1823 = vmatmul.mubr.msk.bf16.vlgmr.msra.gmra.mrb[0].mxu0 %vm980_vm10, %v963_v13  ;;  %1858 = vmatprep.mubr.msk.bf16.mxu1 %vm980_vm10, %v963_v13 }
  0xa9   : > { %v664_v14 = vpop.permute.xlu0 %663  ;;  %1839 = vmatpush3.bf16.msra.mxu0 %v1115_v0 }
  0xaa   : > { %684 = vst.msk [vmem:[#allocation2 + $0x20] sm:$0xff] %vm679_vm8, %v664_v14 }
  0xac   : > { %v666_v15 = vpop.permute.xlu1 %665  ;;  %v964_v17 = vld [vmem:[#allocation2 + $0x18] sm:$0xff] }
  0xad   : > { %685 = vst.msk [vmem:[#allocation2 + $0x28] sm:$0xff] %vm679_vm8, %v666_v15  ;;  %v896_v18 = vpop.permute.xlu0 %895  ;;  %1826 = vmatprep.mubr.msk.bf16.mxu0 %vm980_vm10, %v964_v17  ;;  %1859 = vmatmul.mubr.msk.bf16.vlgmr.msra.gmra.mrb[0].mxu1 %vm980_vm10, %v964_v17 }
  0xae   : > { %916 = vst.msk [vmem:[#allocation2 + $0x20] sm:$0xff] %vm911_vm9, %v896_v18  ;;  %1875 = vmatpush3.bf16.msra.mxu1 %v1406_v1 }
  0xb0   : > { %v898_v19 = vpop.permute.xlu1 %897 }
  0xb1   : > { %917 = vst.msk [vmem:[#allocation2 + $0x28] sm:$0xff] %vm911_vm9, %v898_v19 }
  0xb4   : > { %v668_v20 = vpop.permute.xlu0 %667 }
  0xb5   : > { %686 = vst.msk [vmem:[#allocation2 + $0x30] sm:$0xff] %vm679_vm8, %v668_v20  ;;  %v965_v21 = vld [vmem:[#allocation2 + $0x20] sm:$0xff] }
  0xb6   : > { %1827 = vmatmul.mubr.msk.bf16.gmra.mrb[4].mxu0 %vm980_vm10, %v965_v21  ;;  %1862 = vmatprep.mubr.msk.bf16.mxu1 %vm980_vm10, %v965_v21 }
  0xb8   : > { %v670_v22 = vpop.permute.xlu1 %669  ;;  %v900_v23 = vpop.permute.xlu0 %899  ;;  %v966_v24 = vld [vmem:[#allocation2 + $0x28] sm:$0xff] }
  0xb9   : > { %687 = vst.msk [vmem:[#allocation2 + $0x38] sm:$0xff] %vm679_vm8, %v670_v22  ;;  %1830 = vmatprep.mubr.msk.bf16.mxu0 %vm980_vm10, %v966_v24  ;;  %1863 = vmatmul.mubr.msk.bf16.gmra.mrb[4].mxu1 %vm980_vm10, %v966_v24 }
  0xba   : > { %918 = vst.msk [vmem:[#allocation2 + $0x30] sm:$0xff] %vm911_vm9, %v900_v23 }
  0xbc   : > { %v902_v25 = vpop.permute.xlu1 %901 }
  0xbd   : > { %919 = vst.msk [vmem:[#allocation2 + $0x38] sm:$0xff] %vm911_vm9, %v902_v25 }
  0xc0   : > { %v749_v26 = vpop.permute.xlu0 %748 }
  0xc1   : > { %v967_v27 = vld [vmem:[#allocation2 + $0x30] sm:$0xff]  ;;  %754 = vst.msk [vmem:[#allocation2 + $0x40] sm:$0xff] %vm679_vm8, %v749_v26 }
  0xc2   : > { %1831 = vmatmul.mubr.msk.bf16.gmra.mrb[8].mxu0 %vm980_vm10, %v967_v27  ;;  %1866 = vmatprep.mubr.msk.bf16.mxu1 %vm980_vm10, %v967_v27 }
  0xc4   : > { %v751_v28 = vpop.permute.xlu1 %750  ;;  %v953_v30 = vpop.permute.xlu0 %952  ;;  %v968_v31 = vld [vmem:[#allocation2 + $0x38] sm:$0xff] }
  0xc5   : > { %755 = vst.msk [vmem:[#allocation2 + $0x48] sm:$0xff] %vm679_vm8, %v751_v28  ;;  %1834 = vmatprep.mubr.msk.bf16.mxu0 %vm980_vm10, %v968_v31  ;;  %1867 = vmatmul.mubr.msk.bf16.gmra.mrb[8].mxu1 %vm980_vm10, %v968_v31 }
  0xc6   : > { %958 = vst.msk [vmem:[#allocation2 + $0x40] sm:$0xff] %vm911_vm9, %v953_v30 }
  0xc8   : > { %v955_v32 = vpop.permute.xlu1 %954 }
  0xc9   : > { %959 = vst.msk [vmem:[#allocation2 + $0x48] sm:$0xff] %vm911_vm9, %v955_v32 }
  0xcc   : > { %v888_v33 = vpop.permute.xlu1 %887 }
  0xcd   : > { %v971_v34 = vld [vmem:[#allocation2 + $0x40] sm:$0xff]  ;;  %v656_v35 = vpop.permute.xlu0 %655 }
  0xce   : > { %1835 = vmatmul.mubr.msk.bf16.gmra.mrb[12].mxu0 %vm980_vm10, %v971_v34  ;;  %1870 = vmatprep.mubr.msk.bf16.mxu1 %vm980_vm10, %v971_v34  ;;  %680 = vst.msk [vmem:[#allocation2] sm:$0xff] %vm679_vm8, %v656_v35 }
  0xcf   : > { %912 = vst.msk [vmem:[#allocation2] sm:$0xff] %vm911_vm9, %v888_v33 }
  0xd0   : > { %v1264_v36 = vld [vmem:[#allocation2 + $0x48] sm:$0xff] }
  0xd1   : > { %1871 = vmatmul.mubr.msk.bf16.gmra.mrb[12].mxu1 %vm980_vm10, %v1264_v36 }
  0xd2   : > { %1876 = vmatprep.mubr.msk.bf16.mxu1 %vm980_vm10, %v2339_v29 }
  0xd6   : > { %v961_v37 = vld [vmem:[#allocation2] sm:$0xff] }
  0xd7   : > { %1840 = vmatprep.mubr.msk.bf16.mxu0 %vm980_vm10, %v961_v37 }
  0xd8   : > { %1841 = vmatmul.mubr.msk.bf16.vlgmr.msra.gmra.mrb[0].mxu0 %vm980_vm10, %v2339_v29 }
  0xd9   : > { %1844 = vmatprep.mubr.msk.bf16.mxu0 %vm980_vm10, %v963_v13  ;;  %1877 = vmatmul.mubr.msk.bf16.vlgmr.msra.gmra.mrb[0].mxu1 %vm980_vm10, %v963_v13 }
  0xda   : > { %1880 = vmatprep.mubr.msk.bf16.mxu1 %vm980_vm10, %v964_v17 }
  0xe0   : > { %1845 = vmatmul.mubr.msk.bf16.gmra.mrb[4].mxu0 %vm980_vm10, %v964_v17 }
  0xe1   : > { %1848 = vmatprep.mubr.msk.bf16.mxu0 %vm980_vm10, %v965_v21  ;;  %1881 = vmatmul.mubr.msk.bf16.gmra.mrb[4].mxu1 %vm980_vm10, %v965_v21 }
  0xe2   : > { %1884 = vmatprep.mubr.msk.bf16.mxu1 %vm980_vm10, %v966_v24 }
  0xe8   : > { %1849 = vmatmul.mubr.msk.bf16.gmra.mrb[8].mxu0 %vm980_vm10, %v966_v24 }
  0xe9   : > { %1852 = vmatprep.mubr.msk.bf16.mxu0 %vm980_vm10, %v967_v27  ;;  %1885 = vmatmul.mubr.msk.bf16.gmra.mrb[8].mxu1 %vm980_vm10, %v967_v27 }
  0xea   : > { %1888 = vmatprep.mubr.msk.bf16.mxu1 %vm980_vm10, %v968_v31 }
  0xf0   : > { %1853 = vmatmul.mubr.msk.bf16.gmra.mrb[12].mxu0 %vm980_vm10, %v968_v31 }
  0xf1   : > { %1889 = vmatmul.mubr.msk.bf16.gmra.mrb[12].mxu1 %vm980_vm10, %v971_v34 }
 0x1ab   : > { %v1842_v39 = vpop.f32.mrb[0].mxu0 }
 0x1ac   : > { %v1222_v40 = vadd.f32 %v1842_v39, %v2399_v38  ;;  %v1151_v41 = vpop.f32.mrb[1].mxu0  ;;  %v1878_v42 = vpop.f32.mrb[0].mxu1 }
 0x1ad   : > { %v1220_v43 = vadd.f32 %v2399_v38, %v1151_v41  ;;  %v1507_v44 = vadd.f32 %v1878_v42, %v2399_v38  ;;  %v1843_v45 = vpop.f32.mrb[2].mxu0  ;;  %v1442_v46 = vpop.f32.mrb[1].mxu1 }
 0x1ae   : > { %1239 = vst.msk [vmem:[%s2404_s12 + $0x20] sm:$0xff] %vm1236_vm11, %v1222_v40  ;;  %v1223_v47 = vadd.f32 %v1843_v45, %v2399_v38  ;;  %v1505_v48 = vadd.f32 %v2399_v38, %v1442_v46  ;;  %v1154_v49 = vpop.f32.mrb[3].mxu0  ;;  %v1879_v50 = vpop.f32.mrb[2].mxu1 }
 0x1af   : > { %1237 = vst.msk [vmem:[%s2404_s12] sm:$0xff] %vm1236_vm11, %v1220_v43  ;;  %1759 = vst.msk [vmem:[%s2404_s12 + $0x30] sm:$0xff] %vm1236_vm11, %v1507_v44  ;;  %v1221_v51 = vadd.f32 %v2399_v38, %v1154_v49  ;;  %v1508_v52 = vadd.f32 %v1879_v50, %v2399_v38  ;;  %v1445_v53 = vpop.f32.mrb[3].mxu1 }
 0x1b0   : > { %1240 = vst.msk [vmem:[%s2404_s12 + $0x28] sm:$0xff] %vm1236_vm11, %v1223_v47  ;;  %1757 = vst.msk [vmem:[%s2404_s12 + $0x10] sm:$0xff] %vm1236_vm11, %v1505_v48  ;;  %v1506_v54 = vadd.f32 %v2399_v38, %v1445_v53 }
 0x1b1   : > { %1238 = vst.msk [vmem:[%s2404_s12 + $0x8] sm:$0xff] %vm1236_vm11, %v1221_v51  ;;  %1760 = vst.msk [vmem:[%s2404_s12 + $0x38] sm:$0xff] %vm1236_vm11, %v1508_v52 }
 0x1b2   : > { %1758 = vst.msk [vmem:[%s2404_s12 + $0x18] sm:$0xff] %vm1236_vm11, %v1506_v54 }
 0x1b3   : > { %v1846_v55 = vpop.f32.mrb[4].mxu0 }
 0x1b4   : > { %v1226_v56 = vadd.f32 %v1846_v55, %v2399_v38  ;;  %v1167_v57 = vpop.f32.mrb[5].mxu0  ;;  %v1882_v58 = vpop.f32.mrb[4].mxu1 }
 0x1b5   : > { %v1224_v59 = vadd.f32 %v2399_v38, %v1167_v57  ;;  %v1511_v60 = vadd.f32 %v1882_v58, %v2399_v38  ;;  %v1847_v61 = vpop.f32.mrb[6].mxu0  ;;  %v1458_v62 = vpop.f32.mrb[5].mxu1 }
 0x1b6   : > { %1243 = vst.msk [vmem:[%s2404_s12 + $0x60] sm:$0xff] %vm1236_vm11, %v1226_v56  ;;  %v1227_v63 = vadd.f32 %v1847_v61, %v2399_v38  ;;  %v1509_v0 = vadd.f32 %v2399_v38, %v1458_v62  ;;  %v1170_v1 = vpop.f32.mrb[7].mxu0  ;;  %v1883_v2 = vpop.f32.mrb[6].mxu1 }
 0x1b7   : > { %1241 = vst.msk [vmem:[%s2404_s12 + $0x40] sm:$0xff] %vm1236_vm11, %v1224_v59  ;;  %1763 = vst.msk [vmem:[%s2404_s12 + $0x70] sm:$0xff] %vm1236_vm11, %v1511_v60  ;;  %v1225_v3 = vadd.f32 %v2399_v38, %v1170_v1  ;;  %v1512_v4 = vadd.f32 %v1883_v2, %v2399_v38  ;;  %v1461_v5 = vpop.f32.mrb[7].mxu1 }
 0x1b8   : > { %1244 = vst.msk [vmem:[%s2404_s12 + $0x68] sm:$0xff] %vm1236_vm11, %v1227_v63  ;;  %1761 = vst.msk [vmem:[%s2404_s12 + $0x50] sm:$0xff] %vm1236_vm11, %v1509_v0  ;;  %v1510_v6 = vadd.f32 %v2399_v38, %v1461_v5 }
 0x1b9   : > { %1242 = vst.msk [vmem:[%s2404_s12 + $0x48] sm:$0xff] %vm1236_vm11, %v1225_v3  ;;  %1764 = vst.msk [vmem:[%s2404_s12 + $0x78] sm:$0xff] %vm1236_vm11, %v1512_v4 }
 0x1ba   : > { %1762 = vst.msk [vmem:[%s2404_s12 + $0x58] sm:$0xff] %vm1236_vm11, %v1510_v6 }
 0x1bb   : > { %v1850_v7 = vpop.f32.mrb[8].mxu0 }
 0x1bc   : > { %v1230_v8 = vadd.f32 %v1850_v7, %v2399_v38  ;;  %v1183_v9 = vpop.f32.mrb[9].mxu0  ;;  %v1886_v16 = vpop.f32.mrb[8].mxu1 }
 0x1bd   : > { %v1228_v10 = vadd.f32 %v2399_v38, %v1183_v9  ;;  %v1515_v29 = vadd.f32 %v1886_v16, %v2399_v38  ;;  %v1851_v11 = vpop.f32.mrb[10].mxu0  ;;  %v1474_v12 = vpop.f32.mrb[9].mxu1 }
 0x1be   : > { %1247 = vst.msk [vmem:[%s2404_s12 + $0xa0] sm:$0xff] %vm1236_vm11, %v1230_v8  ;;  %v1231_v13 = vadd.f32 %v1851_v11, %v2399_v38  ;;  %v1513_v14 = vadd.f32 %v2399_v38, %v1474_v12  ;;  %v1186_v15 = vpop.f32.mrb[11].mxu0  ;;  %v1887_v17 = vpop.f32.mrb[10].mxu1 }
 0x1bf   : > { %1245 = vst.msk [vmem:[%s2404_s12 + $0x80] sm:$0xff] %vm1236_vm11, %v1228_v10  ;;  %1767 = vst.msk [vmem:[%s2404_s12 + $0xb0] sm:$0xff] %vm1236_vm11, %v1515_v29  ;;  %v1229_v18 = vadd.f32 %v2399_v38, %v1186_v15  ;;  %v1516_v19 = vadd.f32 %v1887_v17, %v2399_v38  ;;  %v1477_v20 = vpop.f32.mrb[11].mxu1 }
 0x1c0   : > { %1248 = vst.msk [vmem:[%s2404_s12 + $0xa8] sm:$0xff] %vm1236_vm11, %v1231_v13  ;;  %1765 = vst.msk [vmem:[%s2404_s12 + $0x90] sm:$0xff] %vm1236_vm11, %v1513_v14  ;;  %v1514_v21 = vadd.f32 %v2399_v38, %v1477_v20 }
 0x1c1   : > { %1246 = vst.msk [vmem:[%s2404_s12 + $0x88] sm:$0xff] %vm1236_vm11, %v1229_v18  ;;  %1768 = vst.msk [vmem:[%s2404_s12 + $0xb8] sm:$0xff] %vm1236_vm11, %v1516_v19 }
 0x1c2   : > { %1766 = vst.msk [vmem:[%s2404_s12 + $0x98] sm:$0xff] %vm1236_vm11, %v1514_v21 }
 0x1c3   : > { %v1854_v22 = vpop.f32.mrb[12].mxu0 }
 0x1c4   : > { %v1234_v23 = vadd.f32 %v1854_v22, %v2399_v38  ;;  %v1199_v24 = vpop.f32.mrb[13].mxu0  ;;  %v1890_v25 = vpop.f32.mrb[12].mxu1 }
 0x1c5   : > { %v1232_v26 = vadd.f32 %v2399_v38, %v1199_v24  ;;  %v1519_v27 = vadd.f32 %v1890_v25, %v2399_v38  ;;  %v1855_v28 = vpop.f32.mrb[14].mxu0  ;;  %v1490_v30 = vpop.f32.mrb[13].mxu1 }
 0x1c6   : > { %1251 = vst.msk [vmem:[%s2404_s12 + $0xe0] sm:$0xff] %vm1236_vm11, %v1234_v23  ;;  %v1235_v31 = vadd.f32 %v1855_v28, %v2399_v38  ;;  %v1517_v32 = vadd.f32 %v2399_v38, %v1490_v30  ;;  %v1202_v33 = vpop.f32.mrb[15].mxu0  ;;  %v1891_v34 = vpop.f32.mrb[14].mxu1 }
 0x1c7   : > { %1249 = vst.msk [vmem:[%s2404_s12 + $0xc0] sm:$0xff] %vm1236_vm11, %v1232_v26  ;;  %1771 = vst.msk [vmem:[%s2404_s12 + $0xf0] sm:$0xff] %vm1236_vm11, %v1519_v27  ;;  %v1233_v35 = vadd.f32 %v2399_v38, %v1202_v33  ;;  %v1520_v36 = vadd.f32 %v1891_v34, %v2399_v38  ;;  %v1493_v37 = vpop.f32.mrb[15].mxu1 }
 0x1c8   : > { %1252 = vst.msk [vmem:[%s2404_s12 + $0xe8] sm:$0xff] %vm1236_vm11, %v1235_v31  ;;  %1769 = vst.msk [vmem:[%s2404_s12 + $0xd0] sm:$0xff] %vm1236_vm11, %v1517_v32  ;;  %v1518_v39 = vadd.f32 %v2399_v38, %v1493_v37 }
 0x1c9   : > { %1250 = vst.msk [vmem:[%s2404_s12 + $0xc8] sm:$0xff] %vm1236_vm11, %v1233_v35  ;;  %1772 = vst.msk [vmem:[%s2404_s12 + $0xf8] sm:$0xff] %vm1236_vm11, %v1520_v36 }
 0x1ca   : > { %1770 = vst.msk [vmem:[%s2404_s12 + $0xd8] sm:$0xff] %vm1236_vm11, %v1518_v39 }
 0x1cb PF: > { %s14_s19 = sadd.s32 1, %s2025_s19   ;;  %s2527_s15 = smov %s2017_s17 }
 0x1cc   : > { %p11_p9 = scmp.ge.s32.totalorder %s14_s19, 6   ;;  %s2528_s16 = smov %s2021_s18 }
 0x1cd   : > { %s2529_s17 = smov %s2532_s20  ;;  %s2530_s18 = smov %s2536_s21 }
 0x1ce   :  { %13 = sbr.rel (!%p11_p9) target bundleno = 3 (0x3), region = 73 }

</bundles_post_ra>
